<compile_context>
chip_gen: v7x
topology: tpu7x:2x2x1
jax: 0.10.0
libtpu: 0.0.40
codegen_flags: <defaults>
</compile_context>

<pallas_src>
import functools

import jax
import jax.numpy as jnp
from jax.experimental import pallas as pl
from jax.experimental.pallas import tpu as pltpu


def _round_up(x, m):
    return (x + m - 1) // m * m


# ---------------------------------------------------------------------------
# Fast path: tables resident in VMEM, rows gathered with dynamic VMEM loads.
# ---------------------------------------------------------------------------
def _skipgram_vmem_kernel(tgt_ref, ctx_ref, emb_ref, out_tab_ref, o_ref,
                          tbuf, cbuf, *, tile_b):
    # tgt_ref/ctx_ref : (B_pad,) int32 in SMEM (scalar-prefetched indices)
    # emb_ref/out_tab_ref : full (V, D) tables, resident in VMEM
    # o_ref           : (1, tile_b) output block (lane-dense scores)
    # tbuf/cbuf       : (tile_b, D) VMEM gather buffers (table dtype)
    base = pl.program_id(0) * tile_b

    # Fully unrolled gather (tile_b is a static Python int): straight-line
    # SMEM index reads + dynamic VMEM row loads, no DMA descriptors.
    for b in range(tile_b):
        t = tgt_ref[base + b]
        c = ctx_ref[base + b]
        tbuf[pl.ds(b, 1), :] = emb_ref[pl.ds(t, 1), :]
        cbuf[pl.ds(b, 1), :] = out_tab_ref[pl.ds(c, 1), :]

    # torch.sum(target_emb * context_emb, dim=1) for this tile (f32 accumulate).
    prod = tbuf[...].astype(jnp.float32) * cbuf[...].astype(jnp.float32)
    scores = jnp.sum(prod, axis=1, keepdims=True)          # (tile_b, 1)
    o_ref[...] = jnp.transpose(scores, (1, 0))             # lane-dense (1, tile_b)


# ---------------------------------------------------------------------------
# Large-vocab path: tables stay in HBM, per-row DMA gather.
# ---------------------------------------------------------------------------
def _skipgram_hbm_kernel(tgt_ref, ctx_ref, emb_hbm, out_hbm, o_ref,
                         tbuf, cbuf, sem, *, tile_b):
    base = pl.program_id(0) * tile_b

    # Fully unrolled DMA issue: descriptor issue (scalar + vector-misc slots)
    # is the binding resource here, so pack index reads, address math and
    # descriptor pushes back-to-back with no loop overhead.
    for b in range(tile_b):
        t = tgt_ref[base + b]
        c = ctx_ref[base + b]
        pltpu.make_async_copy(emb_hbm.at[t], tbuf.at[b], sem.at[0]).start()
        pltpu.make_async_copy(out_hbm.at[c], cbuf.at[b], sem.at[1]).start()

    # Coalesced waits: one descriptor per semaphore sized for the whole
    # (tile_b, D) buffer == the sum of the tile_b row copies issued on it.
    # (Each buffer carries its own table's dtype, so sizes always match.)
    pltpu.make_async_copy(tbuf, tbuf, sem.at[0]).wait()
    pltpu.make_async_copy(cbuf, cbuf, sem.at[1]).wait()

    prod = tbuf[...].astype(jnp.float32) * cbuf[...].astype(jnp.float32)
    scores = jnp.sum(prod, axis=1, keepdims=True)          # (tile_b, 1)
    o_ref[...] = jnp.transpose(scores, (1, 0))             # lane-dense (1, tile_b)


def skipgram_forward(target, context, emb_weight, out_weight, *,
                     max_tile_b=256,
                     vmem_table_budget_bytes=None,
                     force_hbm_gather=False):
    """Equivalent of SkipGramModel.forward(target, context) -> (B,) scores."""
    B = target.shape[0]
    V, D = emb_weight.shape
    assert out_weight.shape == (V, D)

    emb_dt = jnp.dtype(emb_weight.dtype)
    out_dt = jnp.dtype(out_weight.dtype)
    res_dt = jnp.promote_types(emb_dt, out_dt)

    # torch.nn.Embedding would raise on out-of-range indices; we clamp instead.
    tgt = jnp.clip(target.astype(jnp.int32), 0, V - 1)
    ctx = jnp.clip(context.astype(jnp.int32), 0, V - 1)

    # ---- batch tiling ------------------------------------------------------
    b8 = _round_up(B, 8)
    if b8 <= max_tile_b:
        tile_b = b8                                      # single tile
    else:
        tile_b = max(128, (max_tile_b // 128) * 128)     # lane-dense multi-tile
    b_pad = _round_up(B, tile_b)
    if b_pad != B:
        pad = b_pad - B
        tgt = jnp.pad(tgt, (0, pad))   # padded entries gather row 0, sliced off below
        ctx = jnp.pad(ctx, (0, pad))
    grid = (b_pad // tile_b,)

    # ---- dispatch: VMEM-resident tables vs. HBM per-row gather -------------
    table_bytes = V * D * (emb_dt.itemsize + out_dt.itemsize)
    scratch_bytes = tile_b * D * (emb_dt.itemsize + out_dt.itemsize)
    if vmem_table_budget_bytes is None:
        try:
            cap = pltpu.get_tpu_info().vmem_capacity_bytes
            # ~21 MiB on v7x (64 MiB), ~42 MiB on v5e/v6e (128 MiB), cap at 48 MiB.
            vmem_table_budget_bytes = min(cap // 3, 48 << 20)
        except Exception:
            vmem_table_budget_bytes = 24 << 20           # safe on all generations
    use_vmem_tables = (not force_hbm_gather) and (table_bytes <= vmem_table_budget_bytes)

    idx_bytes = 2 * b_pad * 4
    out_bytes = b_pad * 4
    if use_vmem_tables:
        kernel = functools.partial(_skipgram_vmem_kernel, tile_b=tile_b)
        table_specs = [
            pl.BlockSpec(memory_space=pltpu.MemorySpace.VMEM),   # embeddings.weight
            pl.BlockSpec(memory_space=pltpu.MemorySpace.VMEM),   # output.weight
        ]
        scratch = [
            pltpu.VMEM((tile_b, D), emb_dt),
            pltpu.VMEM((tile_b, D), out_dt),
        ]
        bytes_accessed = table_bytes + idx_bytes + out_bytes
        vmem_needed = 2 * table_bytes + 2 * scratch_bytes + (4 << 20)
    else:
        kernel = functools.partial(_skipgram_hbm_kernel, tile_b=tile_b)
        table_specs = [
            pl.BlockSpec(memory_space=pl.ANY),                   # embeddings.weight (HBM)
            pl.BlockSpec(memory_space=pl.ANY),                   # output.weight (HBM)
        ]
        scratch = [
            pltpu.VMEM((tile_b, D), emb_dt),
            pltpu.VMEM((tile_b, D), out_dt),
            pltpu.SemaphoreType.DMA((2,)),
        ]
        bytes_accessed = b_pad * D * (emb_dt.itemsize + out_dt.itemsize) + idx_bytes + out_bytes
        vmem_needed = 2 * scratch_bytes + (4 << 20)

    vmem_limit = int(min(max(vmem_needed, 32 << 20), 100 << 20))

    out = pl.pallas_call(
        kernel,
        out_shape=jax.ShapeDtypeStruct((1, b_pad), jnp.float32),
        grid_spec=pltpu.PrefetchScalarGridSpec(
            num_scalar_prefetch=2,           # tgt, ctx indices -> SMEM
            grid=grid,
            in_specs=table_specs,
            out_specs=pl.BlockSpec((1, tile_b), lambda i, tgt_pref, ctx_pref: (0, i)),
            scratch_shapes=scratch,
        ),
        compiler_params=pltpu.CompilerParams(
            dimension_semantics=("parallel",),
            vmem_limit_bytes=vmem_limit,
        ),
        cost_estimate=pl.CostEstimate(
            flops=2 * b_pad * D,
            transcendentals=0,
            bytes_accessed=int(bytes_accessed),
        ),
    )(tgt, ctx, emb_weight, out_weight)

    return out[0, :B].astype(res_dt)


if __name__ == "__main__":
    # Small, deterministic setup consistent with SkipGramModel(vocab_size, embedding_dim)
    vocab_size = 64
    embedding_dim = 128
    batch = 8

    key = jax.random.PRNGKey(0)
    k_emb, k_out, k_tgt, k_ctx = jax.random.split(key, 4)

    # nn.Embedding default init: N(0, 1)
    emb_weight = jax.random.normal(k_emb, (vocab_size, embedding_dim), dtype=jnp.float32)
    out_weight = jax.random.normal(k_out, (vocab_size, embedding_dim), dtype=jnp.float32)

    target = jax.random.randint(k_tgt, (batch,), 0, vocab_size, dtype=jnp.int32)
    context = jax.random.randint(k_ctx, (batch,), 0, vocab_size, dtype=jnp.int32)

    # Pure-JAX reference for correctness
    ref = jnp.sum(emb_weight[target] * out_weight[context], axis=1)

    # 1) VMEM-resident-table fast path (what small/medium vocabs hit).
    scores = jax.block_until_ready(
        skipgram_forward(target, context, emb_weight, out_weight))
    assert scores.shape == (batch,)
    assert jnp.allclose(scores, ref, atol=1e-5, rtol=1e-5), (scores, ref)

    # 2) HBM per-row-DMA gather path (what very large vocabs hit), forced here.
    scores_hbm = jax.block_until_ready(
        skipgram_forward(target, context, emb_weight, out_weight,
                         force_hbm_gather=True))
    assert jnp.allclose(scores_hbm, ref, atol=1e-5, rtol=1e-5), (scores_hbm, ref)

    # 3) Multi-tile batch (exercises the grid, padding and lane-dense out spec).
    k_t2, k_c2 = jax.random.split(jax.random.PRNGKey(1))
    batch2 = 300
    t2 = jax.random.randint(k_t2, (batch2,), 0, vocab_size, dtype=jnp.int32)
    c2 = jax.random.randint(k_c2, (batch2,), 0, vocab_size, dtype=jnp.int32)
    ref2 = jnp.sum(emb_weight[t2] * out_weight[c2], axis=1)
    scores2 = jax.block_until_ready(
        skipgram_forward(t2, c2, emb_weight, out_weight, max_tile_b=128))
    assert scores2.shape == (batch2,)
    assert jnp.allclose(scores2, ref2, atol=1e-5, rtol=1e-5)

    print("KERNEL_OK")
</pallas_src>

<mosaic_0001>
module attributes {stable_mosaic.version = 11 : i64} {
  func.func @_skipgram_vmem_kernel(%arg0: i32, %arg1: memref<8xi32, #tpu.memory_space<smem>>, %arg2: memref<8xi32, #tpu.memory_space<smem>>, %arg3: memref<64x128xf32, #tpu.memory_space<vmem>>, %arg4: memref<64x128xf32, #tpu.memory_space<vmem>>, %arg5: memref<1x8xf32, #tpu.memory_space<vmem>>, %arg6: memref<8x128xf32, #tpu.memory_space<vmem>>, %arg7: memref<8x128xf32, #tpu.memory_space<vmem>>) attributes {dimension_semantics = [#tpu.dimension_semantics<parallel>], iteration_bounds = array<i64: 1>, scalar_prefetch = 2 : i64, scratch_operands = 2 : i64, tpu.core_type = #tpu.core_type<tc>, window_params = [{pipeline_mode = #tpu.pipeline_mode<synchronous>, transform_indices = @transform_0, window_bounds = array<i64: 64, 128>}, {pipeline_mode = #tpu.pipeline_mode<synchronous>, transform_indices = @transform_1, window_bounds = array<i64: 64, 128>}, {transform_indices = @transform_2, window_bounds = array<i64: 1, 8>}]} {
    %c8_i32 = arith.constant 8 : i32
    %0 = arith.muli %arg0, %c8_i32 : i32
    %c0_i32 = arith.constant 0 : i32
    %1 = arith.addi %0, %c0_i32 : i32
    %2 = arith.index_cast %1 : i32 to index
    %3 = memref.load %arg1[%2] : memref<8xi32, #tpu.memory_space<smem>>
    %c0_i32_0 = arith.constant 0 : i32
    %4 = arith.addi %0, %c0_i32_0 : i32
    %5 = arith.index_cast %4 : i32 to index
    %6 = memref.load %arg2[%5] : memref<8xi32, #tpu.memory_space<smem>>
    %7 = arith.index_cast %3 : i32 to index
    %c0 = arith.constant 0 : index
    %8 = vector.load %arg3[%7, %c0] : memref<64x128xf32, #tpu.memory_space<vmem>>, vector<1x128xf32>
    %c0_1 = arith.constant 0 : index
    %c0_2 = arith.constant 0 : index
    %9 = vector.load %arg6[%c0_1, %c0_2] : memref<8x128xf32, #tpu.memory_space<vmem>>, vector<1x128xf32>
    tpu.vector_store %arg6[%c0_1, %c0_2], %8 {strides = array<i32>} : memref<8x128xf32, #tpu.memory_space<vmem>>, vector<1x128xf32>,
    %10 = arith.index_cast %6 : i32 to index
    %c0_3 = arith.constant 0 : index
    %11 = vector.load %arg4[%10, %c0_3] : memref<64x128xf32, #tpu.memory_space<vmem>>, vector<1x128xf32>
    %c0_4 = arith.constant 0 : index
    %c0_5 = arith.constant 0 : index
    %12 = vector.load %arg7[%c0_4, %c0_5] : memref<8x128xf32, #tpu.memory_space<vmem>>, vector<1x128xf32>
    tpu.vector_store %arg7[%c0_4, %c0_5], %11 {strides = array<i32>} : memref<8x128xf32, #tpu.memory_space<vmem>>, vector<1x128xf32>,
    %c1_i32 = arith.constant 1 : i32
    %13 = arith.addi %0, %c1_i32 : i32
    %14 = arith.index_cast %13 : i32 to index
    %15 = memref.load %arg1[%14] : memref<8xi32, #tpu.memory_space<smem>>
    %c1_i32_6 = arith.constant 1 : i32
    %16 = arith.addi %0, %c1_i32_6 : i32
    %17 = arith.index_cast %16 : i32 to index
    %18 = memref.load %arg2[%17] : memref<8xi32, #tpu.memory_space<smem>>
    %19 = arith.index_cast %15 : i32 to index
    %c0_7 = arith.constant 0 : index
    %20 = vector.load %arg3[%19, %c0_7] : memref<64x128xf32, #tpu.memory_space<vmem>>, vector<1x128xf32>
    %c1 = arith.constant 1 : index
    %c0_8 = arith.constant 0 : index
    %21 = vector.load %arg6[%c1, %c0_8] : memref<8x128xf32, #tpu.memory_space<vmem>>, vector<1x128xf32>
    tpu.vector_store %arg6[%c1, %c0_8], %20 {strides = array<i32>} : memref<8x128xf32, #tpu.memory_space<vmem>>, vector<1x128xf32>,
    %22 = arith.index_cast %18 : i32 to index
    %c0_9 = arith.constant 0 : index
    %23 = vector.load %arg4[%22, %c0_9] : memref<64x128xf32, #tpu.memory_space<vmem>>, vector<1x128xf32>
    %c1_10 = arith.constant 1 : index
    %c0_11 = arith.constant 0 : index
    %24 = vector.load %arg7[%c1_10, %c0_11] : memref<8x128xf32, #tpu.memory_space<vmem>>, vector<1x128xf32>
    tpu.vector_store %arg7[%c1_10, %c0_11], %23 {strides = array<i32>} : memref<8x128xf32, #tpu.memory_space<vmem>>, vector<1x128xf32>,
    %c2_i32 = arith.constant 2 : i32
    %25 = arith.addi %0, %c2_i32 : i32
    %26 = arith.index_cast %25 : i32 to index
    %27 = memref.load %arg1[%26] : memref<8xi32, #tpu.memory_space<smem>>
    %c2_i32_12 = arith.constant 2 : i32
    %28 = arith.addi %0, %c2_i32_12 : i32
    %29 = arith.index_cast %28 : i32 to index
    %30 = memref.load %arg2[%29] : memref<8xi32, #tpu.memory_space<smem>>
    %31 = arith.index_cast %27 : i32 to index
    %c0_13 = arith.constant 0 : index
    %32 = vector.load %arg3[%31, %c0_13] : memref<64x128xf32, #tpu.memory_space<vmem>>, vector<1x128xf32>
    %c2 = arith.constant 2 : index
    %c0_14 = arith.constant 0 : index
    %33 = vector.load %arg6[%c2, %c0_14] : memref<8x128xf32, #tpu.memory_space<vmem>>, vector<1x128xf32>
    tpu.vector_store %arg6[%c2, %c0_14], %32 {strides = array<i32>} : memref<8x128xf32, #tpu.memory_space<vmem>>, vector<1x128xf32>,
    %34 = arith.index_cast %30 : i32 to index
    %c0_15 = arith.constant 0 : index
    %35 = vector.load %arg4[%34, %c0_15] : memref<64x128xf32, #tpu.memory_space<vmem>>, vector<1x128xf32>
    %c2_16 = arith.constant 2 : index
    %c0_17 = arith.constant 0 : index
    %36 = vector.load %arg7[%c2_16, %c0_17] : memref<8x128xf32, #tpu.memory_space<vmem>>, vector<1x128xf32>
    tpu.vector_store %arg7[%c2_16, %c0_17], %35 {strides = array<i32>} : memref<8x128xf32, #tpu.memory_space<vmem>>, vector<1x128xf32>,
    %c3_i32 = arith.constant 3 : i32
    %37 = arith.addi %0, %c3_i32 : i32
    %38 = arith.index_cast %37 : i32 to index
    %39 = memref.load %arg1[%38] : memref<8xi32, #tpu.memory_space<smem>>
    %c3_i32_18 = arith.constant 3 : i32
    %40 = arith.addi %0, %c3_i32_18 : i32
    %41 = arith.index_cast %40 : i32 to index
    %42 = memref.load %arg2[%41] : memref<8xi32, #tpu.memory_space<smem>>
    %43 = arith.index_cast %39 : i32 to index
    %c0_19 = arith.constant 0 : index
    %44 = vector.load %arg3[%43, %c0_19] : memref<64x128xf32, #tpu.memory_space<vmem>>, vector<1x128xf32>
    %c3 = arith.constant 3 : index
    %c0_20 = arith.constant 0 : index
    %45 = vector.load %arg6[%c3, %c0_20] : memref<8x128xf32, #tpu.memory_space<vmem>>, vector<1x128xf32>
    tpu.vector_store %arg6[%c3, %c0_20], %44 {strides = array<i32>} : memref<8x128xf32, #tpu.memory_space<vmem>>, vector<1x128xf32>,
    %46 = arith.index_cast %42 : i32 to index
    %c0_21 = arith.constant 0 : index
    %47 = vector.load %arg4[%46, %c0_21] : memref<64x128xf32, #tpu.memory_space<vmem>>, vector<1x128xf32>
    %c3_22 = arith.constant 3 : index
    %c0_23 = arith.constant 0 : index
    %48 = vector.load %arg7[%c3_22, %c0_23] : memref<8x128xf32, #tpu.memory_space<vmem>>, vector<1x128xf32>
    tpu.vector_store %arg7[%c3_22, %c0_23], %47 {strides = array<i32>} : memref<8x128xf32, #tpu.memory_space<vmem>>, vector<1x128xf32>,
    %c4_i32 = arith.constant 4 : i32
    %49 = arith.addi %0, %c4_i32 : i32
    %50 = arith.index_cast %49 : i32 to index
    %51 = memref.load %arg1[%50] : memref<8xi32, #tpu.memory_space<smem>>
    %c4_i32_24 = arith.constant 4 : i32
    %52 = arith.addi %0, %c4_i32_24 : i32
    %53 = arith.index_cast %52 : i32 to index
    %54 = memref.load %arg2[%53] : memref<8xi32, #tpu.memory_space<smem>>
    %55 = arith.index_cast %51 : i32 to index
    %c0_25 = arith.constant 0 : index
    %56 = vector.load %arg3[%55, %c0_25] : memref<64x128xf32, #tpu.memory_space<vmem>>, vector<1x128xf32>
    %c4 = arith.constant 4 : index
    %c0_26 = arith.constant 0 : index
    %57 = vector.load %arg6[%c4, %c0_26] : memref<8x128xf32, #tpu.memory_space<vmem>>, vector<1x128xf32>
    tpu.vector_store %arg6[%c4, %c0_26], %56 {strides = array<i32>} : memref<8x128xf32, #tpu.memory_space<vmem>>, vector<1x128xf32>,
    %58 = arith.index_cast %54 : i32 to index
    %c0_27 = arith.constant 0 : index
    %59 = vector.load %arg4[%58, %c0_27] : memref<64x128xf32, #tpu.memory_space<vmem>>, vector<1x128xf32>
    %c4_28 = arith.constant 4 : index
    %c0_29 = arith.constant 0 : index
    %60 = vector.load %arg7[%c4_28, %c0_29] : memref<8x128xf32, #tpu.memory_space<vmem>>, vector<1x128xf32>
    tpu.vector_store %arg7[%c4_28, %c0_29], %59 {strides = array<i32>} : memref<8x128xf32, #tpu.memory_space<vmem>>, vector<1x128xf32>,
    %c5_i32 = arith.constant 5 : i32
    %61 = arith.addi %0, %c5_i32 : i32
    %62 = arith.index_cast %61 : i32 to index
    %63 = memref.load %arg1[%62] : memref<8xi32, #tpu.memory_space<smem>>
    %c5_i32_30 = arith.constant 5 : i32
    %64 = arith.addi %0, %c5_i32_30 : i32
    %65 = arith.index_cast %64 : i32 to index
    %66 = memref.load %arg2[%65] : memref<8xi32, #tpu.memory_space<smem>>
    %67 = arith.index_cast %63 : i32 to index
    %c0_31 = arith.constant 0 : index
    %68 = vector.load %arg3[%67, %c0_31] : memref<64x128xf32, #tpu.memory_space<vmem>>, vector<1x128xf32>
    %c5 = arith.constant 5 : index
    %c0_32 = arith.constant 0 : index
    %69 = vector.load %arg6[%c5, %c0_32] : memref<8x128xf32, #tpu.memory_space<vmem>>, vector<1x128xf32>
    tpu.vector_store %arg6[%c5, %c0_32], %68 {strides = array<i32>} : memref<8x128xf32, #tpu.memory_space<vmem>>, vector<1x128xf32>,
    %70 = arith.index_cast %66 : i32 to index
    %c0_33 = arith.constant 0 : index
    %71 = vector.load %arg4[%70, %c0_33] : memref<64x128xf32, #tpu.memory_space<vmem>>, vector<1x128xf32>
    %c5_34 = arith.constant 5 : index
    %c0_35 = arith.constant 0 : index
    %72 = vector.load %arg7[%c5_34, %c0_35] : memref<8x128xf32, #tpu.memory_space<vmem>>, vector<1x128xf32>
    tpu.vector_store %arg7[%c5_34, %c0_35], %71 {strides = array<i32>} : memref<8x128xf32, #tpu.memory_space<vmem>>, vector<1x128xf32>,
    %c6_i32 = arith.constant 6 : i32
    %73 = arith.addi %0, %c6_i32 : i32
    %74 = arith.index_cast %73 : i32 to index
    %75 = memref.load %arg1[%74] : memref<8xi32, #tpu.memory_space<smem>>
    %c6_i32_36 = arith.constant 6 : i32
    %76 = arith.addi %0, %c6_i32_36 : i32
    %77 = arith.index_cast %76 : i32 to index
    %78 = memref.load %arg2[%77] : memref<8xi32, #tpu.memory_space<smem>>
    %79 = arith.index_cast %75 : i32 to index
    %c0_37 = arith.constant 0 : index
    %80 = vector.load %arg3[%79, %c0_37] : memref<64x128xf32, #tpu.memory_space<vmem>>, vector<1x128xf32>
    %c6 = arith.constant 6 : index
    %c0_38 = arith.constant 0 : index
    %81 = vector.load %arg6[%c6, %c0_38] : memref<8x128xf32, #tpu.memory_space<vmem>>, vector<1x128xf32>
    tpu.vector_store %arg6[%c6, %c0_38], %80 {strides = array<i32>} : memref<8x128xf32, #tpu.memory_space<vmem>>, vector<1x128xf32>,
    %82 = arith.index_cast %78 : i32 to index
    %c0_39 = arith.constant 0 : index
    %83 = vector.load %arg4[%82, %c0_39] : memref<64x128xf32, #tpu.memory_space<vmem>>, vector<1x128xf32>
    %c6_40 = arith.constant 6 : index
    %c0_41 = arith.constant 0 : index
    %84 = vector.load %arg7[%c6_40, %c0_41] : memref<8x128xf32, #tpu.memory_space<vmem>>, vector<1x128xf32>
    tpu.vector_store %arg7[%c6_40, %c0_41], %83 {strides = array<i32>} : memref<8x128xf32, #tpu.memory_space<vmem>>, vector<1x128xf32>,
    %c7_i32 = arith.constant 7 : i32
    %85 = arith.addi %0, %c7_i32 : i32
    %86 = arith.index_cast %85 : i32 to index
    %87 = memref.load %arg1[%86] : memref<8xi32, #tpu.memory_space<smem>>
    %c7_i32_42 = arith.constant 7 : i32
    %88 = arith.addi %0, %c7_i32_42 : i32
    %89 = arith.index_cast %88 : i32 to index
    %90 = memref.load %arg2[%89] : memref<8xi32, #tpu.memory_space<smem>>
    %91 = arith.index_cast %87 : i32 to index
    %c0_43 = arith.constant 0 : index
    %92 = vector.load %arg3[%91, %c0_43] : memref<64x128xf32, #tpu.memory_space<vmem>>, vector<1x128xf32>
    %c7 = arith.constant 7 : index
    %c0_44 = arith.constant 0 : index
    %93 = vector.load %arg6[%c7, %c0_44] : memref<8x128xf32, #tpu.memory_space<vmem>>, vector<1x128xf32>
    tpu.vector_store %arg6[%c7, %c0_44], %92 {strides = array<i32>} : memref<8x128xf32, #tpu.memory_space<vmem>>, vector<1x128xf32>,
    %94 = arith.index_cast %90 : i32 to index
    %c0_45 = arith.constant 0 : index
    %95 = vector.load %arg4[%94, %c0_45] : memref<64x128xf32, #tpu.memory_space<vmem>>, vector<1x128xf32>
    %c7_46 = arith.constant 7 : index
    %c0_47 = arith.constant 0 : index
    %96 = vector.load %arg7[%c7_46, %c0_47] : memref<8x128xf32, #tpu.memory_space<vmem>>, vector<1x128xf32>
    tpu.vector_store %arg7[%c7_46, %c0_47], %95 {strides = array<i32>} : memref<8x128xf32, #tpu.memory_space<vmem>>, vector<1x128xf32>,
    %c0_48 = arith.constant 0 : index
    %c0_49 = arith.constant 0 : index
    %97 = vector.load %arg6[%c0_48, %c0_49] : memref<8x128xf32, #tpu.memory_space<vmem>>, vector<8x128xf32>
    %c0_50 = arith.constant 0 : index
    %c0_51 = arith.constant 0 : index
    %98 = vector.load %arg7[%c0_50, %c0_51] : memref<8x128xf32, #tpu.memory_space<vmem>>, vector<8x128xf32>
    %99 = arith.mulf %97, %98 : vector<8x128xf32>
    %cst = arith.constant dense<0.000000e+00> : vector<8xf32>
    %100 = vector.multi_reduction <add>, %99, %cst [1] : vector<8x128xf32> to vector<8xf32>
    %101 = vector.shape_cast %100 : vector<8xf32> to vector<8x1xf32>
    %102 = tpu.transpose %101, [1, 0] : vector<8x1xf32> -> vector<1x8xf32>
    %c0_52 = arith.constant 0 : index
    %c0_53 = arith.constant 0 : index
    %103 = vector.load %arg5[%c0_52, %c0_53] : memref<1x8xf32, #tpu.memory_space<vmem>>, vector<1x8xf32>
    tpu.vector_store %arg5[%c0_52, %c0_53], %102 {strides = array<i32>} : memref<1x8xf32, #tpu.memory_space<vmem>>, vector<1x8xf32>,
    return
  }
  func.func @transform_0(%arg0: i32, %arg1: memref<8xi32, #tpu.memory_space<smem>>, %arg2: memref<8xi32, #tpu.memory_space<smem>>) -> (i32, i32) {
    %c0_i32 = arith.constant 0 : i32
    %c0_i32_0 = arith.constant 0 : i32
    %c0_i32_1 = arith.constant 0 : i32
    return %c0_i32, %c0_i32_0 : i32, i32
  }
  func.func @transform_1(%arg0: i32, %arg1: memref<8xi32, #tpu.memory_space<smem>>, %arg2: memref<8xi32, #tpu.memory_space<smem>>) -> (i32, i32) {
    %c0_i32 = arith.constant 0 : i32
    %c0_i32_0 = arith.constant 0 : i32
    %c0_i32_1 = arith.constant 0 : i32
    return %c0_i32, %c0_i32_0 : i32, i32
  }
  func.func @transform_2(%arg0: i32, %arg1: memref<8xi32, #tpu.memory_space<smem>>, %arg2: memref<8xi32, #tpu.memory_space<smem>>) -> (i32, i32) {
    %c0_i32 = arith.constant 0 : i32
    %c0_i32_0 = arith.constant 0 : i32
    return %c0_i32, %arg0 : i32, i32
  }
}

</mosaic_0001>

<bundles_post_ra>
// kernel: tpu_custom_call.1
= control target key start
LH: loop header
LB: loop body
LE: loop exit
PB: predicated region body
PF: predicated region fallthrough
CT: control target
= control target key end

     0   :  { %s406_s0 = inlined_call_operand.hbm [shape: s32[8], index: 0, kind: input, shape index: {}]   ;;  %s407_s2 = inlined_call_operand.hbm [shape: f32[64,128], index: 2, kind: input, shape index: {}]   ;;  %s408_s3 = inlined_call_operand.hbm [shape: f32[64,128], index: 3, kind: input, shape index: {}]   ;;  %s409_s4 = inlined_call_operand.hbm [shape: f32[1,8], index: 4, kind: output, shape index: {}]   ;;  %s410_s1 = inlined_call_operand.vmem [shape: s32[8], index: 1, kind: input, shape index: {}]  }
   0x1   :  { %s215_s17 = scalar_lea.hbm %s406_s0, 16 }
   0x2   :  { %p216_p0 = scmp.ne.s32.totalorder %s406_s0, %s215_s17  ;;  %p219_p1 = scmp.lt.u32.totalorder %s215_s17, %s406_s0 }
   0x4   :  { %p221_p2 = pnand %p219_p1, %p216_p0 }
   0x6   :  { %224 = shalt.err (!%p221_p2)  }
   0x7   :  { %s311_s22 = smov [#allocation5]   ;;  %s11_s27 = sshll.u32 %s410_s1, 4  ;;  %s12_s27 = int_to_ptr.vmem [resolvable:$true] %s11_s27 }
   0x8   :  { %10 = dma.hbm_to_smem %s406_s0, 16, %s311_s22, [#allocation4] }
   0x9   :  { %s225_s28 = scalar_lea.vmem %s12_s27, 16  ;;  %p230_p4 = scmp.lt.s32.totalorder %s12_s27, %s12_s27 }
   0xa   :  { %p226_p3 = scmp.ne.s32.totalorder %s12_s27, %s225_s28  ;;  %p231_p5 = scmp.lt.s32.totalorder %s225_s28, %s225_s28 }
   0xc   :  { %p232_p6 = por %p231_p5, %p230_p4 }
   0xe   :  { %p233_p7 = pnand %p232_p6, %p226_p3 }
  0x10   :  { %236 = shalt.err (!%p233_p7)  }
  0x11   :  { %s312_s29 = smov [#allocation6]  }
  0x12   :  { %14 = dma.vmem_to_smem %s12_s27, 16, %s312_s29, [#allocation4] }
  0x13   :  { %303 = dma.done.wait [#allocation4], 32 }
  0x14   :  { %304 = vsyncadd [#allocation4], 4294967264 }
  0x15   :  { %16 = sfence }
  0x16   :  { %17 = vsyncpa [#allocation8], 0 }
  0x17   :  { %18 = vsyncpa [#allocation11], 0 }
  0x18   :  { %19 = vsyncpa [#allocation9], 0  ;;  %s313_s0 = smov [#allocation7]   ;;  %s237_s6 = scalar_lea.hbm %s407_s2, 1024 }
  0x19   :  { %s25_s30 = sshll.u32 %s313_s0, 4  ;;  %p238_p8 = scmp.ne.s32.totalorder %s407_s2, %s237_s6  ;;  %s26_s30 = int_to_ptr.vmem [resolvable:$true] %s25_s30 }
  0x1a   :  { %p241_p9 = scmp.lt.u32.totalorder %s237_s6, %s407_s2 }
  0x1c   :  { %p243_p10 = pnand %p241_p9, %p238_p8 }
  0x1e   :  { %246 = shalt.err (!%p243_p10)
}
  0x1f   :  { %s247_s11 = scalar_lea.vmem %s26_s30, 1024  ;;  %p252_p12 = scmp.lt.s32.totalorder %s26_s30, %s26_s30 }
  0x20   :  { %p248_p11 = scmp.ne.s32.totalorder %s26_s30, %s247_s11  ;;  %p253_p13 = scmp.lt.s32.totalorder %s247_s11, %s247_s11 }
  0x22   :  { %p254_p0 = por %p253_p13, %p252_p12 }
  0x24   :  { %p255_p1 = pnand %p254_p0, %p248_p11 }
  0x26   :  { %258 = shalt.err (!%p255_p1)
}
  0x27   :  { %s314_s12 = smov 128   ;;  %s315_s13 = smov 8  }
  0x28   :  { %31 = dma.hbm_to_vmem [thread:$0]  %s407_s2, 1024, %s26_s30, [#allocation8], %s314_s12, %s314_s12, %s315_s13  }
  0x29   :  { %s316_s16 = smov [#allocation10]   ;;  %s259_s20 = scalar_lea.hbm %s408_s3, 1024 }
  0x2a   :  { %s37_s17 = sshll.u32 %s316_s16, 4  ;;  %p260_p2 = scmp.ne.s32.totalorder %s408_s3, %s259_s20  ;;  %s38_s17 = int_to_ptr.vmem [resolvable:$true] %s37_s17 }
  0x2b   :  { %p263_p3 = scmp.lt.u32.totalorder %s259_s20, %s408_s3 }
  0x2d   :  { %p265_p4 = pnand %p263_p3, %p260_p2 }
  0x2f   :  { %268 = shalt.err (!%p265_p4)
}
  0x30   :  { %s269_s25 = scalar_lea.vmem %s38_s17, 1024  ;;  %p274_p6 = scmp.lt.s32.totalorder %s38_s17, %s38_s17 }
  0x31   :  { %p270_p5 = scmp.ne.s32.totalorder %s38_s17, %s269_s25  ;;  %p275_p7 = scmp.lt.s32.totalorder %s269_s25, %s269_s25 }
  0x33   :  { %p276_p8 = por %p275_p7, %p274_p6 }
  0x35   :  { %p277_p9 = pnand %p276_p8, %p270_p5 }
  0x37   :  { %280 = shalt.err (!%p277_p9)
}
  0x38   :  { %43 = dma.hbm_to_vmem [thread:$0]  %s408_s3, 1024, %s38_s17, [#allocation11], %s314_s12, %s314_s12, %s315_s13  }
  0x39   :  { %305 = dma.done.wait [#allocation8], 1024  }
  0x3a   :  { %306 = vsyncadd [#allocation8], 4294966272 }
  0x3b   :  { %307 = dma.done.wait [#allocation11], 1024  }
  0x3c   :  { %308 = vsyncadd [#allocation11], 4294966272  ;;  %s51_s27 = sld [smem:[#allocation5]]  ;;  %s193_s29 = sld [smem:[#allocation5 + $0x1]]  ;;  %vm159_vm0 = vcmask 57344  }
  0x3d   :  { %s52_s28 = sld [smem:[#allocation6]]  ;;  %s194_s0 = sld [smem:[#allocation6 + $0x1]] }
  0x3e   :  { %s195_s30 = sld [smem:[#allocation5 + $0x2]]  ;;  %s197_s5 = sld [smem:[#allocation5 + $0x3]] }
  0x3f   :  { %s196_s1 = sld [smem:[#allocation6 + $0x2]]  ;;  %s198_s6 = sld [smem:[#allocation6 + $0x3]] }
  0x40   :  { %s382_s7 = sld [smem:[#allocation5 + $0x4]]  ;;  %s386_s9 = sld [smem:[#allocation5 + $0x5]] }
  0x41   :  { %s384_s8 = sld [smem:[#allocation6 + $0x4]]  ;;  %s388_s10 = sld [smem:[#allocation6 + $0x5]] }
  0x42   :  { %s53_s3 = scalar_lea.vmem [#allocation7], %s51_s27  ;;  %s62_s12 = scalar_lea.vmem [#allocation7], %s193_s29 }
  0x43   :  { %v54_v0 = vld [vmem:[%s53_s3] sm:$0x1]  ;;  %s56_s11 = scalar_lea.vmem [#allocation10], %s52_s28  ;;  %s65_s13 = scalar_lea.vmem [#allocation10], %s194_s0 }
  0x44   :  { %v57_v1 = vld [vmem:[%s56_s11] sm:$0x1]  ;;  %55 = vst [vmem:[#allocation2] sm:$0x1] %v54_v0  ;;  %s71_s14 = scalar_lea.vmem [#allocation7], %s195_s30  ;;  %s80_s16 = scalar_lea.vmem [#allocation7], %s197_s5 }
  0x45   :  { %58 = vst [vmem:[#allocation3] sm:$0x1] %v57_v1  ;;  %v63_v2 = vld [vmem:[%s62_s12] sm:$0x1]  ;;  %s74_s15 = scalar_lea.vmem [#allocation10], %s196_s1  ;;  %s83_s17 = scalar_lea.vmem [#allocation10], %s198_s6 }
  0x46   :  { %v66_v3 = vld [vmem:[%s65_s13] sm:$0x1]  ;;  %64 = vst [vmem:[#allocation2 + $0x1] sm:$0x1] %v63_v2  ;;  %s89_s18 = scalar_lea.vmem [#allocation7], %s382_s7  ;;  %s98_s20 = scalar_lea.vmem [#allocation7], %s386_s9 }
  0x47   :  { %67 = vst [vmem:[#allocation3 + $0x1] sm:$0x1] %v66_v3  ;;  %v72_v4 = vld [vmem:[%s71_s14] sm:$0x1]  ;;  %s92_s19 = scalar_lea.vmem [#allocation10], %s384_s8  ;;  %s101_s21 = scalar_lea.vmem [#allocation10], %s388_s10 }
  0x48   :  { %v75_v5 = vld [vmem:[%s74_s15] sm:$0x1]  ;;  %73 = vst [vmem:[#allocation2 + $0x2] sm:$0x1] %v72_v4  ;;  %s203_s22 = sld [smem:[#allocation5 + $0x6]]  ;;  %s205_s24 = sld [smem:[#allocation5 + $0x7]] }
  0x49   :  { %76 = vst [vmem:[#allocation3 + $0x2] sm:$0x1] %v75_v5  ;;  %v81_v6 = vld [vmem:[%s80_s16] sm:$0x1]  ;;  %s204_s23 = sld [smem:[#allocation6 + $0x6]]  ;;  %s206_s25 = sld [smem:[#allocation6 + $0x7]] }
  0x4a   :  { %v84_v7 = vld [vmem:[%s83_s17] sm:$0x1]  ;;  %82 = vst [vmem:[#allocation2 + $0x3] sm:$0x1] %v81_v6  ;;  %s317_s29 = smov [#allocation12]  }
  0x4b   :  { %85 = vst [vmem:[#allocation3 + $0x3] sm:$0x1] %v84_v7  ;;  %v90_v8 = vld [vmem:[%s89_s18] sm:$0x1]  ;;  %s167_s0 = sshll.u32 %s317_s29, 4  ;;  %s168_s0 = int_to_ptr.vmem [resolvable:$true] %s167_s0 }
  0x4c   :  { %v93_v9 = vld [vmem:[%s92_s19] sm:$0x1]  ;;  %91 = vst [vmem:[#allocation2 + $0x4] sm:$0x1] %v90_v8  ;;  %s281_s30 = scalar_lea.vmem %s168_s0, 16  ;;  %s285_s1 = scalar_lea.vmem %s168_s0, 32 }
  0x4d   :  { %94 = vst [vmem:[#allocation3 + $0x4] sm:$0x1] %v93_v9  ;;  %v99_v10 = vld [vmem:[%s98_s20] sm:$0x1]  ;;  %p282_p10 = scmp.ne.s32.totalorder %s168_s0, %s281_s30  ;;  %p286_p11 = scmp.lt.s32.totalorder %s168_s0, %s168_s0 }
  0x4e   :  { %v102_v11 = vld [vmem:[%s101_s21] sm:$0x1]  ;;  %100 = vst [vmem:[#allocation2 + $0x5] sm:$0x1] %v99_v10  ;;  %s107_s2 = scalar_lea.vmem [#allocation7], %s203_s22  ;;  %s116_s27 = scalar_lea.vmem [#allocation7], %s205_s24 }
  0x4f   :  { %103 = vst [vmem:[#allocation3 + $0x5] sm:$0x1] %v102_v11  ;;  %v108_v12 = vld [vmem:[%s107_s2] sm:$0x1]  ;;  %s110_s26 = scalar_lea.vmem [#allocation10], %s204_s23  ;;  %s119_s28 = scalar_lea.vmem [#allocation10], %s206_s25 }
  0x50   :  { %109 = vst [vmem:[#allocation2 + $0x6] sm:$0x1] %v108_v12  ;;  %v111_v13 = vld [vmem:[%s110_s26] sm:$0x1]  ;;  %p287_p12 = scmp.lt.s32.totalorder %s285_s1, %s281_s30 }
  0x51   :  { %v117_v14 = vld [vmem:[%s116_s27] sm:$0x1]  ;;  %112 = vst [vmem:[#allocation3 + $0x6] sm:$0x1] %v111_v13 }
  0x52   :  { %118 = vst [vmem:[#allocation2 + $0x7] sm:$0x1] %v117_v14  ;;  %v120_v15 = vld [vmem:[%s119_s28] sm:$0x1]  ;;  %p288_p13 = por %p287_p12, %p286_p11 }
  0x53   :  { %121 = vst [vmem:[#allocation3 + $0x7] sm:$0x1] %v120_v15 }
  0x54   :  { %p289_p0 = pnand %p288_p13, %p282_p10 }
  0x59   :  { %v122_v16 = vld [vmem:[#allocation2] sm:$0xff] }
  0x5a   :  { %v123_v17 = vld [vmem:[#allocation3] sm:$0xff] }
  0x5b   :  { %v124_v18 = vmul.f32 %v123_v17, %v122_v16 }
  0x5d   :  { %125 = vadd.xlane.f32.xlu0 %v124_v18 }
  0xea   :  { %v126_v19 = vpop.xlane.xlu0 %125 }
  0xeb   :  { %127 = vxpose.xlu0.b32.start.end [1/1] (short) (narrow) %v126_v19, 8 }
 0x16b   :  { %v143_v20 = vpop.trf.xlu0 }
 0x16c   :  { %160 = vst.msk [vmem:[#allocation12] sm:$0x1] %vm159_vm0, %v143_v20 }
 0x16d   :  { %292 = shalt.err (!%p289_p0)
}
 0x16e   :  { %s293_s7 = scalar_lea.hbm %s409_s4, 16 }
 0x16f   :  { %p294_p1 = scmp.ne.s32.totalorder %s409_s4, %s293_s7  ;;  %p297_p2 = scmp.lt.u32.totalorder %s293_s7, %s409_s4 }
 0x171   :  { %p299_p3 = pnand %p297_p2, %p294_p1 }
 0x173   :  { %302 = shalt.err (!%p299_p3)
}
 0x174   :  { %170 = dma.vmem_to_hbm [thread:$0]  %s168_s0, 16, %s409_s4, [#allocation9]  }
 0x175   :  { %309 = dma.done.wait [#allocation9], 16  }
 0x176   :  { %310 = vsyncadd [#allocation9], 4294967280 }
 0x177   :  { %174 = vsyncpa [#allocation8], 1 }
 0x178   :  { %175 = vsyncpa [#allocation11], 1 }
 0x179   :  { %176 = vsyncpa [#allocation9], 1 }

</bundles_post_ra>
